<compile_context>
chip_gen: v5e
topology: v5e:2x2
jax: 0.10.0
libtpu: 0.0.40
codegen_flags: <defaults>
</compile_context>

<pallas_src>
import math

import jax
import jax.numpy as jnp
from jax.experimental import pallas as pl
from jax.experimental.pallas import tpu as pltpu


# ----------------------------- kernels ------------------------------------- #

def _normalize_kernel(x_ref, p_ref, o_ref):
    # p_ref[0] = mean, p_ref[1] = 1/std   (both broadcast over rows)
    x = x_ref[...].astype(jnp.float32)
    mean = p_ref[0:1, :]
    inv_std = p_ref[1:2, :]
    o_ref[...] = ((x - mean) * inv_std).astype(o_ref.dtype)


def _denormalize_kernel(x_ref, p_ref, o_ref):
    # p_ref[0] = mean, p_ref[1] = std
    x = x_ref[...].astype(jnp.float32)
    mean = p_ref[0:1, :]
    std = p_ref[1:2, :]
    o_ref[...] = (x * std + mean).astype(o_ref.dtype)


# ----------------------------- wrapper -------------------------------------- #

_TARGET_BLOCK_BYTES = 2 << 20   # ~2 MiB per x tile; ~8 MiB in flight with
                                # in+out double buffering -> safe on v5e/v6e/v7x.
_MAX_TILED_LANES = 8192         # cap on the lane-dense width (param array size)


def _apply_affine(kernel, x, params_h, params_w, lane_w):
    """Stream x through `kernel` with a lane-dense, ~2 MiB row tiling."""
    orig_shape = x.shape
    H = orig_shape[-1]
    total = x.size

    # Pick the lane-dense 2-D view.
    if H % 128 == 0:
        W, params = H, params_h
    elif (params_w is not None) and (total % lane_w == 0):
        # View the whole tensor as [total/W, W] with W = lcm(H, 128).  Since
        # H | W, lane j of every row maps to hidden index j % H, so the params
        # are simply tiled across lanes (done once at init).
        W, params = lane_w, params_w
    else:
        # Fallback: correct but with masked (partial-lane) stores.
        W, params = H, params_h

    x2 = x.reshape(-1, W)
    N = x2.shape[0]
    itemsize = jnp.dtype(x2.dtype).itemsize

    # Row tile: ~2 MiB, multiple of 8 sublanes (or the full row count).
    tr = max(1, _TARGET_BLOCK_BYTES // (W * itemsize))
    tr = (tr // 8) * 8
    if tr < 8 or tr >= N:
        tr = N

    grid = (pl.cdiv(N, tr),)

    out = pl.pallas_call(
        kernel,
        out_shape=jax.ShapeDtypeStruct((N, W), x2.dtype),
        grid_spec=pltpu.PrefetchScalarGridSpec(
            num_scalar_prefetch=0,
            grid=grid,
            in_specs=[
                pl.BlockSpec((tr, W), lambda i: (i, 0)),   # streaming x tile
                pl.BlockSpec((2, W), lambda i: (0, 0)),    # resident params
            ],
            out_specs=pl.BlockSpec((tr, W), lambda i: (i, 0)),
        ),
        compiler_params=pltpu.CompilerParams(
            dimension_semantics=("parallel",)),
    )(x2, params)

    return out.reshape(orig_shape)


class EncNormalizer:
    """JAX/Pallas port of the PyTorch EncNormalizer.

    Parameters are built deterministically in-script (no .pt loading).
    """

    def __init__(self, hidden: int, key=None):
        # Deterministic synthetic "checkpoint": mean ~ N(0,1), std in (0.5, 1.5)
        if key is None:
            key = jax.random.PRNGKey(42)
        k_mean, k_std = jax.random.split(key)
        self.enc_mean = jax.random.normal(k_mean, (1, 1, hidden), jnp.float32)
        self.enc_std = 0.5 + jax.random.uniform(k_std, (1, 1, hidden), jnp.float32)

        mean_vec = self.enc_mean.reshape(-1)                  # (H,)
        std_vec = self.enc_std.reshape(-1)                    # (H,)
        # Exact reciprocal, computed once -> no per-element divide in kernels.
        # (If checkpoints could contain zeros, add an epsilon here.)
        inv_std_vec = 1.0 / std_vec

        # Packed params: row 0 = mean, row 1 = scale (1/std or std).
        self._norm_params_h = jnp.stack([mean_vec, inv_std_vec])    # (2, H)
        self._denorm_params_h = jnp.stack([mean_vec, std_vec])      # (2, H)

        # Lane-dense width W = lcm(H, 128); params tiled W/H times across lanes.
        self._lane_w = (hidden * 128) // math.gcd(hidden, 128)
        if hidden % 128 != 0 and self._lane_w <= _MAX_TILED_LANES:
            rep = self._lane_w // hidden
            self._norm_params_w = jnp.stack(
                [jnp.tile(mean_vec, rep), jnp.tile(inv_std_vec, rep)])
            self._denorm_params_w = jnp.stack(
                [jnp.tile(mean_vec, rep), jnp.tile(std_vec, rep)])
        else:
            self._norm_params_w = None
            self._denorm_params_w = None

    def forward(self, x):
        # nn.Identity(): a no-op — no kernel launch, no extra HBM round-trip.
        return x

    def normalize(self, encoding):
        return _apply_affine(_normalize_kernel, encoding,
                             self._norm_params_h, self._norm_params_w,
                             self._lane_w)

    def denormalize(self, pred_x_0):
        return _apply_affine(_denormalize_kernel, pred_x_0,
                             self._denorm_params_h, self._denorm_params_w,
                             self._lane_w)


# ------------------------------- main --------------------------------------- #

if __name__ == "__main__":
    B, S, H = 2, 8, 32
    key = jax.random.PRNGKey(0)
    k_x, k_params = jax.random.split(key)
    x = jax.random.normal(k_x, (B, S, H), jnp.float32)

    norm = EncNormalizer(hidden=H, key=k_params)

    y_fwd = norm.forward(x)
    y_norm = norm.normalize(x)
    y_denorm = norm.denormalize(y_norm)

    jax.block_until_ready((y_fwd, y_norm, y_denorm))

    # Pure-JAX references (spec semantics: divide / mul+add).
    ref_norm = (x - norm.enc_mean) / norm.enc_std
    ref_denorm = ref_norm * norm.enc_std + norm.enc_mean

    assert jnp.allclose(y_fwd, x, atol=0, rtol=0), "identity mismatch"
    assert jnp.allclose(y_norm, ref_norm, atol=1e-6, rtol=1e-6), "normalize mismatch"
    assert jnp.allclose(y_denorm, ref_denorm, atol=1e-6, rtol=1e-6), "denormalize mismatch"
    assert jnp.allclose(y_denorm, x, atol=1e-5, rtol=1e-5), "roundtrip mismatch"

    print("KERNEL_OK")
</pallas_src>

<mosaic_0001>
module attributes {stable_mosaic.version = 11 : i64} {
  func.func @_normalize_kernel(%arg0: i32, %arg1: memref<4x128xf32, #tpu.memory_space<vmem>>, %arg2: memref<2x128xf32, #tpu.memory_space<vmem>>, %arg3: memref<4x128xf32, #tpu.memory_space<vmem>>) attributes {dimension_semantics = [#tpu.dimension_semantics<parallel>], iteration_bounds = array<i64: 1>, scalar_prefetch = 0 : i64, scratch_operands = 0 : i64, tpu.core_type = #tpu.core_type<tc>, window_params = [{transform_indices = @transform_0, window_bounds = array<i64: 4, 128>}, {pipeline_mode = #tpu.pipeline_mode<synchronous>, transform_indices = @transform_1, window_bounds = array<i64: 2, 128>}, {transform_indices = @transform_2, window_bounds = array<i64: 4, 128>}]} {
    %c0 = arith.constant 0 : index
    %c0_0 = arith.constant 0 : index
    %0 = vector.load %arg1[%c0, %c0_0] : memref<4x128xf32, #tpu.memory_space<vmem>>, vector<4x128xf32>
    %c0_1 = arith.constant 0 : index
    %c0_2 = arith.constant 0 : index
    %1 = vector.load %arg2[%c0_1, %c0_2] : memref<2x128xf32, #tpu.memory_space<vmem>>, vector<1x128xf32>
    %c1 = arith.constant 1 : index
    %c0_3 = arith.constant 0 : index
    %2 = vector.load %arg2[%c1, %c0_3] : memref<2x128xf32, #tpu.memory_space<vmem>>, vector<1x128xf32>
    %3 = vector.broadcast %1 : vector<1x128xf32> to vector<4x128xf32>
    %4 = arith.subf %0, %3 : vector<4x128xf32>
    %5 = vector.broadcast %2 : vector<1x128xf32> to vector<4x128xf32>
    %6 = arith.mulf %4, %5 : vector<4x128xf32>
    %c0_4 = arith.constant 0 : index
    %c0_5 = arith.constant 0 : index
    %7 = vector.load %arg3[%c0_4, %c0_5] : memref<4x128xf32, #tpu.memory_space<vmem>>, vector<4x128xf32>
    tpu.vector_store %arg3[%c0_4, %c0_5], %6 {strides = array<i32>} : memref<4x128xf32, #tpu.memory_space<vmem>>, vector<4x128xf32>,
    return
  }
  func.func @transform_0(%arg0: i32) -> (i32, i32) {
    %c0_i32 = arith.constant 0 : i32
    %c0_i32_0 = arith.constant 0 : i32
    return %arg0, %c0_i32 : i32, i32
  }
  func.func @transform_1(%arg0: i32) -> (i32, i32) {
    %c0_i32 = arith.constant 0 : i32
    %c0_i32_0 = arith.constant 0 : i32
    %c0_i32_1 = arith.constant 0 : i32
    return %c0_i32, %c0_i32_0 : i32, i32
  }
  func.func @transform_2(%arg0: i32) -> (i32, i32) {
    %c0_i32 = arith.constant 0 : i32
    %c0_i32_0 = arith.constant 0 : i32
    return %arg0, %c0_i32 : i32, i32
  }
}

</mosaic_0001>

<bundles_post_ra>
// kernel: tpu_custom_call.1
= control target key start
LH: loop header
LB: loop body
LE: loop exit
PB: predicated region body
PF: predicated region fallthrough
CT: control target
= control target key end

     0   :  { %7 = vsyncpa [#allocation3], 0  ;;  %s176_s0 = inlined_call_operand.hbm [shape: f32[4,128], index: 0, kind: input, shape index: {}]   ;;  %s177_s1 = inlined_call_operand.hbm [shape: f32[2,128], index: 1, kind: input, shape index: {}]   ;;  %s178_s2 = inlined_call_operand.hbm [shape: f32[4,128], index: 2, kind: output, shape index: {}]  }
   0x1   :  { %8 = vsyncpa [#allocation6], 0 }
   0x2   :  { %9 = vsyncpa [#allocation4], 0  ;;  %s15_s11 = sshll.u32 %s176_s0, 4  ;;  %s149_s12 = smov [#allocation2]   ;;  %s16_s11 = int_to_ptr.hbm [resolvable:$true] %s15_s11 }
   0x3   :  { %s17_s13 = sshll.u32 %s149_s12, 4  ;;  %s26_s16 = sshll.u32 %s177_s1, 4  ;;  %s18_s13 = int_to_ptr.vmem [resolvable:$true] %s17_s13  ;;  %s27_s16 = int_to_ptr.hbm [resolvable:$true] %s26_s16 }
   0x4   :  { %20 = dma.hbm_to_vmem [thread:$0]  %s16_s11, 64, %s18_s13, [#allocation3]  }
   0x5   :  { %s150_s17 = smov [#allocation5]  }
   0x6   :  { %s28_s18 = sshll.u32 %s150_s17, 4  ;;  %s29_s18 = int_to_ptr.vmem [resolvable:$true] %s28_s18 }
   0x7   :  { %31 = dma.hbm_to_vmem [thread:$0]  %s27_s16, 32, %s29_s18, [#allocation6]  }
   0x8   :  { %143 = dma.done.wait [#allocation3], 64  }
   0x9   :  { %144 = vsyncadd [#allocation3], 4294967232 }
   0xa   :  { %145 = dma.done.wait [#allocation6], 32  }
   0xb   :  { %146 = vsyncadd [#allocation6], 4294967264  ;;  %v40_v0 = vld [vmem:[#allocation2] sm:$0xf]  ;;  %v69_v1 = vld [vmem:[#allocation5] ss:$0 sm:$0xff] }
   0xc   :  { %v70_v2 = vld [vmem:[#allocation5 + $0x1] ss:$0 sm:$0xff]  ;;  %s151_s0 = smov [#allocation7]   ;;  %s55_s22 = sshll.u32 %s178_s2, 4  ;;  %v44_v3 = vsub.f32 %v40_v0, %v69_v1  ;;  %s56_s22 = int_to_ptr.hbm [resolvable:$true] %s55_s22 }
   0xd   :  { %s53_s19 = sshll.u32 %s151_s0, 4  ;;  %s54_s19 = int_to_ptr.vmem [resolvable:$true] %s53_s19 }
   0xe   :  { %v46_v4 = vmul.f32 %v70_v2, %v44_v3 }
  0x10   :  { %47 = vst [vmem:[#allocation7] sm:$0xf] %v46_v4 }
  0x11   :  { %58 = dma.vmem_to_hbm [thread:$0]  %s54_s19, 64, %s56_s22, [#allocation4]  }
  0x12   :  { %147 = dma.done.wait [#allocation4], 64  }
  0x13   :  { %148 = vsyncadd [#allocation4], 4294967232 }
  0x14   :  { %63 = vsyncpa [#allocation3], 1 }
  0x15   :  { %64 = vsyncpa [#allocation6], 1 }
  0x16   :  { %65 = vsyncpa [#allocation4], 1 }

</bundles_post_ra>
